<compile_context>
chip_gen: v7x
topology: tpu7x:2x2x1
jax: 0.10.0
libtpu: 0.0.40
codegen_flags: <defaults>
</compile_context>

<pallas_src>
import math
from functools import partial

import jax
import jax.numpy as jnp
from jax import lax
from jax.experimental import pallas as pl
from jax.experimental.pallas import tpu as pltpu


_TARGET_STEP_BYTES = 8 * 1024 * 1024   # combined (in+out) HBM traffic per grid step
_MIN_STEP_BYTES = 1 * 1024 * 1024      # never shrink a step below ~1 MiB just to add steps
_MIN_STEPS = 8                         # >= 4 steps per TensorCore on v7x megacore
_MAX_PACK = 16                         # cap on the output-lane packing factor


def _cdiv(a, b):
    return -(-a // b)


def _vmem_limit_bytes():
    """Generation-aware scoped-VMEM limit (128 MiB on v5e/v6e, 64 MiB/TC on v7x)."""
    try:
        cap = int(pltpu.get_tpu_info().vmem_capacity_bytes)
    except Exception:  # interpret mode / older jax: conservative fallback
        cap = 64 * 1024 * 1024
    return int(min(cap * 3 // 4, 100 * 1024 * 1024))


def _row_tile(m_rows, bytes_per_row, vmem_limit):
    """Rows per grid step: big enough to amortize the ~0.35us step overhead,
    small enough to double-buffer inside the VMEM budget and to leave
    >= _MIN_STEPS (preferably even) steps when the problem is large."""
    step_bytes = min(_TARGET_STEP_BYTES, (vmem_limit * 2) // 5)
    tile = max(1, step_bytes // max(bytes_per_row, 1))
    min_rows = max(1, _MIN_STEP_BYTES // max(bytes_per_row, 1))
    if m_rows // _MIN_STEPS >= min_rows:
        tile = min(tile, m_rows // _MIN_STEPS)
    if tile < m_rows:
        tile = max(8, (tile // 8) * 8)
        g = _cdiv(m_rows, tile)
        if g > 2 and g % 2 == 1:  # prefer an even step count (2 TCs on v7x)
            t2 = max(8, ((_cdiv(m_rows, g + 1) + 7) // 8) * 8)
            if _cdiv(m_rows, t2) % 2 == 0:
                tile = t2
    return min(tile, m_rows)


def _pack_factor(out_w, m_rows):
    """Pack P flat rows per kernel row so the output lane width P*out_w is a
    multiple of 128 (dense stores / dense writeback).  P is a power of two,
    capped, and must divide the number of flat rows."""
    if out_w % 128 == 0:
        return 1
    p = min(128 // math.gcd(out_w, 128), _MAX_PACK)
    while p > 1 and m_rows % p != 0:
        p //= 2
    return p


# ---------------------------------------------------------------------------
# Kernels.  x_ref holds a (rows, pack*2*W) tile: pack consecutive H-row-pairs,
# each pair's two original rows concatenated along the lane axis.
# ---------------------------------------------------------------------------
def _wpool_matrix(w, out_w, dtype):
    """(W, out_w) avg-pool-by-2 along W.  Odd W replicates the last column
    (torch.cat([x, x[..., -1:]], -1)) -> weight 1.0 on the last input column.
    Built in-kernel (tiny VPU cost), so there is no constant operand to DMA."""
    r = lax.broadcasted_iota(jnp.int32, (w, out_w), 0)
    c = lax.broadcasted_iota(jnp.int32, (w, out_w), 1)
    mat = jnp.where(r // 2 == c, 0.5, 0.0)
    if w % 2 != 0:
        mat = jnp.where((r == w - 1) & (c == out_w - 1), 1.0, mat)
    return mat.astype(dtype)


def _timepreserve_kernel(x_ref, o_ref, *, w, pack):
    # avg_pool2d(x, (2, 1)): pure VPU adds of two W-wide lane slices per pack.
    x = x_ref[...]
    parts = []
    for p in range(pack):
        left = x[:, p * 2 * w: p * 2 * w + w]
        right = x[:, p * 2 * w + w: (p + 1) * 2 * w]
        parts.append(left + right)
    y = parts[0] if pack == 1 else jnp.concatenate(parts, axis=-1)
    o_ref[...] = (0.5 * y).astype(o_ref.dtype)


def _half_kernel(x_ref, o_ref, *, w, out_w, pack):
    # avg_pool2d(x, 2): H-pool on the VPU (halves MXU K), then a small
    # (W, out_w) matmul per pack segment with f32 accumulation.
    # TODO(synk): on v5e with f32 + very long W the matmul could be replaced by
    # an XLU roll + VPU compaction to stay strictly HBM-bound.
    x = x_ref[...]
    pw = _wpool_matrix(w, out_w, x.dtype)
    parts = []
    for p in range(pack):
        left = x[:, p * 2 * w: p * 2 * w + w]
        right = x[:, p * 2 * w + w: (p + 1) * 2 * w]
        xh = 0.5 * (left + right)
        parts.append(jnp.dot(xh, pw, preferred_element_type=jnp.float32))
    y = parts[0] if pack == 1 else jnp.concatenate(parts, axis=-1)
    o_ref[...] = y.astype(o_ref.dtype)


# ---------------------------------------------------------------------------
# Launcher.
# ---------------------------------------------------------------------------
def _run_kernel(kernel, x2, out_cols):
    m_rows, in_cols = x2.shape
    itemsize = x2.dtype.itemsize
    bytes_per_row = (in_cols + out_cols) * itemsize
    vmem_limit = _vmem_limit_bytes()
    tile = _row_tile(m_rows, bytes_per_row, vmem_limit)
    grid = (_cdiv(m_rows, tile),)

    in_bytes = m_rows * in_cols * itemsize
    out_bytes = m_rows * out_cols * itemsize
    cost = pl.CostEstimate(
        flops=2 * m_rows * in_cols,      # ~one add+mul per input element
        transcendentals=0,
        bytes_accessed=in_bytes + out_bytes,
    )

    return pl.pallas_call(
        kernel,
        grid=grid,
        in_specs=[pl.BlockSpec((tile, in_cols), lambda i: (i, 0))],
        out_specs=pl.BlockSpec((tile, out_cols), lambda i: (i, 0)),
        out_shape=jax.ShapeDtypeStruct((m_rows, out_cols), x2.dtype),
        compiler_params=pltpu.CompilerParams(
            dimension_semantics=("parallel",),
            vmem_limit_bytes=vmem_limit,
        ),
        cost_estimate=cost,
    )(x2)


# ---------------------------------------------------------------------------
# Public entry point (matches DownSample.forward semantics).
# ---------------------------------------------------------------------------
def downsample(x, layer_type):
    """Pallas implementation of styletts2 DownSample.forward.  x is NCHW."""
    if layer_type == "none":
        return x
    if layer_type not in ("timepreserve", "half"):
        raise RuntimeError(
            "Got unexpected donwsampletype %s, expected is [none, timepreserve, half]"
            % layer_type
        )

    N, C, H, W = x.shape
    Hp = (H // 2) * 2
    if Hp != H:
        # F.avg_pool2d with a height-2 kernel silently drops a trailing odd row.
        # TODO(synk): fold the dropped row into the grid/index_map instead of a
        # wrapper slice (one extra HBM copy) -- odd H is rare for this module.
        x = x[:, :, :Hp, :]

    out_w = W if layer_type == "timepreserve" else (W + 1) // 2
    m = N * C * (Hp // 2)
    if m == 0 or W == 0:
        return jnp.zeros((N, C, Hp // 2, out_w), x.dtype)

    pack = _pack_factor(out_w, m)
    # Free, contiguous reshape: kernel row i holds `pack` consecutive original
    # row-pairs, each pair's two H-rows side by side along the lane axis.
    x2 = x.reshape(m // pack, pack * 2 * W)

    if layer_type == "timepreserve":
        kernel = partial(_timepreserve_kernel, w=W, pack=pack)
    else:
        kernel = partial(_half_kernel, w=W, out_w=out_w, pack=pack)

    out2 = _run_kernel(kernel, x2, pack * out_w)
    return out2.reshape(N, C, Hp // 2, out_w)


# ---------------------------------------------------------------------------
# Pure-JAX reference (F.avg_pool2d semantics) and self-test.
# ---------------------------------------------------------------------------
def _reference(x, layer_type):
    if layer_type == "none":
        return x
    N, C, H, W = x.shape
    Hp = (H // 2) * 2
    x = x[:, :, :Hp, :].astype(jnp.float32)
    if layer_type == "timepreserve":
        return x.reshape(N, C, Hp // 2, 2, W).mean(axis=3)
    if W % 2 != 0:
        x = jnp.concatenate([x, x[..., -1:]], axis=-1)
        W += 1
    return x.reshape(N, C, Hp // 2, 2, W // 2, 2).mean(axis=(3, 5))


if __name__ == "__main__":
    key = jax.random.PRNGKey(0)
    k1, k2, k3, k4, k5 = jax.random.split(key, 5)

    x       = jax.random.normal(k1, (2, 4, 16, 16), dtype=jnp.float32)
    x_odd_w = jax.random.normal(k2, (2, 4, 16, 15), dtype=jnp.float32)
    x_wide  = jax.random.normal(k3, (2, 4, 16, 128), dtype=jnp.float32)
    x_odd_h = jax.random.normal(k4, (2, 4, 15, 16), dtype=jnp.float32)
    x_small = jax.random.normal(k5, (1, 3, 2, 16), dtype=jnp.float32)
    x_bf16  = x.astype(jnp.bfloat16)

    cases = [
        ("none", x, 1e-5),
        ("timepreserve", x, 1e-5),        # packed VPU path (W % 128 != 0)
        ("timepreserve", x_wide, 1e-5),   # lane-aligned VPU path (pack = 1)
        ("half", x, 1e-5),                # packed VPU H-pool + MXU W-pool
        ("half", x_odd_w, 1e-5),          # odd W -> replication folded into matrix
        ("half", x_wide, 1e-5),           # W % 128 == 0
        ("half", x_odd_h, 1e-5),          # odd H -> trailing row dropped
        ("half", x_small, 1e-5),          # pack-factor fallback (rows not divisible)
        ("timepreserve", x_bf16, 5e-2),   # bf16 activations
        ("half", x_bf16, 5e-2),
    ]

    ok = True
    for layer_type, inp, tol in cases:
        out = jax.block_until_ready(downsample(inp, layer_type))
        ref = _reference(inp, layer_type)
        if out.shape != ref.shape or not bool(
            jnp.allclose(out.astype(jnp.float32), ref.astype(jnp.float32),
                         rtol=tol, atol=tol)
        ):
            ok = False
            print("MISMATCH", layer_type, tuple(inp.shape), str(inp.dtype))

    if ok:
        print("KERNEL_OK")
</pallas_src>

<mosaic_0001>
module attributes {stable_mosaic.version = 11 : i64} {
  func.func @_timepreserve_kernel(%arg0: i32, %arg1: memref<8x256xf32, #tpu.memory_space<vmem>>, %arg2: memref<8x128xf32, #tpu.memory_space<vmem>>) attributes {dimension_semantics = [#tpu.dimension_semantics<parallel>], iteration_bounds = array<i64: 1>, scalar_prefetch = 0 : i64, scratch_operands = 0 : i64, tpu.core_type = #tpu.core_type<tc>, window_params = [{transform_indices = @transform_0, window_bounds = array<i64: 8, 256>}, {transform_indices = @transform_1, window_bounds = array<i64: 8, 128>}]} {
    %c0 = arith.constant 0 : index
    %c0_0 = arith.constant 0 : index
    %0 = vector.load %arg1[%c0, %c0_0] : memref<8x256xf32, #tpu.memory_space<vmem>>, vector<8x256xf32>
    %1 = vector.extract_strided_slice %0 {offsets = [0, 0], sizes = [8, 16], strides = [1, 1]} : vector<8x256xf32> to vector<8x16xf32>
    %2 = vector.extract_strided_slice %0 {offsets = [0, 16], sizes = [8, 16], strides = [1, 1]} : vector<8x256xf32> to vector<8x16xf32>
    %3 = arith.addf %1, %2 : vector<8x16xf32>
    %4 = vector.extract_strided_slice %0 {offsets = [0, 32], sizes = [8, 16], strides = [1, 1]} : vector<8x256xf32> to vector<8x16xf32>
    %5 = vector.extract_strided_slice %0 {offsets = [0, 48], sizes = [8, 16], strides = [1, 1]} : vector<8x256xf32> to vector<8x16xf32>
    %6 = arith.addf %4, %5 : vector<8x16xf32>
    %7 = vector.extract_strided_slice %0 {offsets = [0, 64], sizes = [8, 16], strides = [1, 1]} : vector<8x256xf32> to vector<8x16xf32>
    %8 = vector.extract_strided_slice %0 {offsets = [0, 80], sizes = [8, 16], strides = [1, 1]} : vector<8x256xf32> to vector<8x16xf32>
    %9 = arith.addf %7, %8 : vector<8x16xf32>
    %10 = vector.extract_strided_slice %0 {offsets = [0, 96], sizes = [8, 16], strides = [1, 1]} : vector<8x256xf32> to vector<8x16xf32>
    %11 = vector.extract_strided_slice %0 {offsets = [0, 112], sizes = [8, 16], strides = [1, 1]} : vector<8x256xf32> to vector<8x16xf32>
    %12 = arith.addf %10, %11 : vector<8x16xf32>
    %13 = vector.extract_strided_slice %0 {offsets = [0, 128], sizes = [8, 16], strides = [1, 1]} : vector<8x256xf32> to vector<8x16xf32>
    %14 = vector.extract_strided_slice %0 {offsets = [0, 144], sizes = [8, 16], strides = [1, 1]} : vector<8x256xf32> to vector<8x16xf32>
    %15 = arith.addf %13, %14 : vector<8x16xf32>
    %16 = vector.extract_strided_slice %0 {offsets = [0, 160], sizes = [8, 16], strides = [1, 1]} : vector<8x256xf32> to vector<8x16xf32>
    %17 = vector.extract_strided_slice %0 {offsets = [0, 176], sizes = [8, 16], strides = [1, 1]} : vector<8x256xf32> to vector<8x16xf32>
    %18 = arith.addf %16, %17 : vector<8x16xf32>
    %19 = vector.extract_strided_slice %0 {offsets = [0, 192], sizes = [8, 16], strides = [1, 1]} : vector<8x256xf32> to vector<8x16xf32>
    %20 = vector.extract_strided_slice %0 {offsets = [0, 208], sizes = [8, 16], strides = [1, 1]} : vector<8x256xf32> to vector<8x16xf32>
    %21 = arith.addf %19, %20 : vector<8x16xf32>
    %22 = vector.extract_strided_slice %0 {offsets = [0, 224], sizes = [8, 16], strides = [1, 1]} : vector<8x256xf32> to vector<8x16xf32>
    %23 = vector.extract_strided_slice %0 {offsets = [0, 240], sizes = [8, 16], strides = [1, 1]} : vector<8x256xf32> to vector<8x16xf32>
    %24 = arith.addf %22, %23 : vector<8x16xf32>
    %25 = tpu.concatenate %3, %6, %9, %12, %15, %18, %21, %24 in 1 : vector<8x16xf32>, vector<8x16xf32>, vector<8x16xf32>, vector<8x16xf32>, vector<8x16xf32>, vector<8x16xf32>, vector<8x16xf32>, vector<8x16xf32> -> vector<8x128xf32>
    %cst = arith.constant 5.000000e-01 : f32
    %26 = vector.broadcast %cst : f32 to vector<8x128xf32>
    %27 = arith.mulf %26, %25 : vector<8x128xf32>
    %c0_1 = arith.constant 0 : index
    %c0_2 = arith.constant 0 : index
    %28 = vector.load %arg2[%c0_1, %c0_2] : memref<8x128xf32, #tpu.memory_space<vmem>>, vector<8x128xf32>
    tpu.vector_store %arg2[%c0_1, %c0_2], %27 {strides = array<i32>} : memref<8x128xf32, #tpu.memory_space<vmem>>, vector<8x128xf32>,
    return
  }
  func.func @transform_0(%arg0: i32) -> (i32, i32) {
    %c0_i32 = arith.constant 0 : i32
    %c0_i32_0 = arith.constant 0 : i32
    return %arg0, %c0_i32 : i32, i32
  }
  func.func @transform_1(%arg0: i32) -> (i32, i32) {
    %c0_i32 = arith.constant 0 : i32
    %c0_i32_0 = arith.constant 0 : i32
    return %arg0, %c0_i32 : i32, i32
  }
}

</mosaic_0001>

<bundles_post_ra>
// kernel: tpu_custom_call.1
= control target key start
LH: loop header
LB: loop body
LE: loop exit
PB: predicated region body
PF: predicated region fallthrough
CT: control target
= control target key end

     0   :  { %6 = vsyncpa [#allocation3], 0  ;;  %s187_s0 = inlined_call_operand.hbm [shape: f32[8,256], index: 0, kind: input, shape index: {}]   ;;  %s188_s1 = inlined_call_operand.hbm [shape: f32[8,128], index: 1, kind: output, shape index: {}]  }
   0x1   :  { %7 = vsyncpa [#allocation4], 0  ;;  %s144_s6 = smov [#allocation2]   ;;  %s96_s10 = scalar_lea.hbm %s187_s0, 256 }
   0x2   :  { %s14_s7 = sshll.u32 %s144_s6, 4  ;;  %p97_p0 = scmp.ne.s32.totalorder %s187_s0, %s96_s10  ;;  %s15_s7 = int_to_ptr.vmem [resolvable:$true] %s14_s7 }
   0x3   :  { %p100_p1 = scmp.lt.u32.totalorder %s96_s10, %s187_s0 }
   0x5   :  { %p102_p2 = pnand %p100_p1, %p97_p0 }
   0x7   :  { %105 = shalt.err (!%p102_p2)
}
   0x8   :  { %s106_s15 = scalar_lea.vmem %s15_s7, 256  ;;  %p111_p4 = scmp.lt.s32.totalorder %s15_s7, %s15_s7 }
   0x9   :  { %p107_p3 = scmp.ne.s32.totalorder %s15_s7, %s106_s15  ;;  %p112_p5 = scmp.lt.s32.totalorder %s106_s15, %s106_s15 }
   0xb   :  { %p113_p6 = por %p112_p5, %p111_p4 }
   0xd   :  { %p114_p7 = pnand %p113_p6, %p107_p3 }
   0xf   :  { %117 = shalt.err (!%p114_p7)
}
  0x10   :  { %17 = dma.hbm_to_vmem [thread:$0]  %s187_s0, 256, %s15_s7, [#allocation3]  }
  0x11   :  { %140 = dma.done.wait [#allocation3], 256  }
  0x12   :  { %141 = vsyncadd [#allocation3], 4294967040  ;;  %v21_v0 = vld [vmem:[#allocation2] sm:$0xff]  ;;  %s145_s18 = smov 112   ;;  %v22_v1 = vld [vmem:[#allocation2 + $0x8] sm:$0xff]  ;;  %s146_s19 = smov 80  }
  0x13   :  { %24 = vrot.lane.b32.xlu0 %v21_v0, %s145_s18  ;;  %s147_s20 = smov 96   ;;  %s148_s21 = smov 48   ;;  %vm56_vm0 = vcmask 130048   ;;  %vm58_vm1 = vcmask 261120   ;;  %vm60_vm2 = vcmask 392192   ;;  %vm62_vm3 = vcmask 523264  }
  0x14   :  { %s149_s22 = smov 16   ;;  %s150_s0 = smov 64   ;;  %vm64_vm4 = vcmask 654336   ;;  %vm66_vm5 = vcmask 785408   ;;  %vm68_vm6 = vcmask 916480  }
  0x15   :  { %s151_s23 = smov 32   ;;  %s152_s24 = smov [#allocation5]  }
  0x16   :  { %s78_s25 = sshll.u32 %s152_s24, 4  ;;  %s79_s25 = int_to_ptr.vmem [resolvable:$true] %s78_s25 }
  0x17   :  { %29 = vrot.lane.b32.xlu0 %v22_v1, %s145_s18  ;;  %s118_s26 = scalar_lea.vmem %s79_s25, 128  ;;  %p123_p9 = scmp.lt.s32.totalorder %s79_s25, %s79_s25 }
  0x18   :  { %p119_p8 = scmp.ne.s32.totalorder %s79_s25, %s118_s26  ;;  %p124_p10 = scmp.lt.s32.totalorder %s118_s26, %s118_s26 }
  0x1a   :  { %p125_p11 = por %p124_p10, %p123_p9 }
  0x1c   :  { %p126_p12 = pnand %p125_p11, %p119_p8 }
  0x85   :  { %v25_v2 = vpop.permute.xlu0 %24 }
  0x86   :  { %v27_v3 = vadd.f32 %v25_v2, %v21_v0 }
  0x88   :  { %40 = vrot.lane.b32.xlu0 %v27_v3, %s146_s19  ;;  %34 = vrot.lane.b32.xlu1 %v27_v3, %s145_s18 }
  0x89   :  { %v30_v4 = vpop.permute.xlu0 %29 }
  0x8a   :  { %v32_v5 = vadd.f32 %v30_v4, %v22_v1 }
  0x8c   :  { %37 = vrot.lane.b32.xlu1 %v27_v3, %s147_s20  ;;  %47 = vrot.lane.b32.xlu0 %v32_v5, %s148_s21 }
  0x90   :  { %53 = vrot.lane.b32.xlu0 %v32_v5, %s149_s22  ;;  %44 = vrot.lane.b32.xlu1 %v32_v5, %s150_s0 }
  0x94   :  { %50 = vrot.lane.b32.xlu1 %v32_v5, %s151_s23 }
  0xfa   :  { %v35_v6 = vpop.permute.xlu1 %34  ;;  %v41_v7 = vpop.permute.xlu0 %40 }
  0xfb   :  { %v57_v8 = vsel %vm56_vm0, %v27_v3, %v35_v6 }
  0xfe   :  { %v38_v9 = vpop.permute.xlu1 %37  ;;  %v48_v11 = vpop.permute.xlu0 %47 }
  0xff   :  { %v59_v10 = vsel %vm58_vm1, %v57_v8, %v38_v9 }
 0x100   :  { %v61_v13 = vsel %vm60_vm2, %v59_v10, %v41_v7 }
 0x102   :  { %v45_v12 = vpop.permute.xlu1 %44  ;;  %v54_v17 = vpop.permute.xlu0 %53 }
 0x103   :  { %v63_v14 = vsel %vm62_vm3, %v61_v13, %v45_v12 }
 0x104   :  { %v65_v16 = vsel %vm64_vm4, %v63_v14, %v48_v11 }
 0x106   :  { %v51_v15 = vpop.permute.xlu1 %50 }
 0x107   :  { %v67_v18 = vsel %vm66_vm5, %v65_v16, %v51_v15 }
 0x108   :  { %v69_v19 = vsel %vm68_vm6, %v67_v18, %v54_v17 }
 0x109   :  { %v70_v20 = vmul.f32 0.5, %v69_v19 }
 0x10b   :  { %71 = vst [vmem:[#allocation5] sm:$0xff] %v70_v20 }
 0x10c   :  { %129 = shalt.err (!%p126_p12)
}
 0x10d   :  { %s130_s29 = scalar_lea.hbm %s188_s1, 128 }
 0x10e   :  { %p131_p13 = scmp.ne.s32.totalorder %s188_s1, %s130_s29  ;;  %p134_p0 = scmp.lt.u32.totalorder %s130_s29, %s188_s1 }
 0x110   :  { %p136_p1 = pnand %p134_p0, %p131_p13 }
 0x112   :  { %139 = shalt.err (!%p136_p1)
}
 0x113   :  { %81 = dma.vmem_to_hbm [thread:$0]  %s79_s25, 128, %s188_s1, [#allocation4]  }
 0x114   :  { %142 = dma.done.wait [#allocation4], 128  }
 0x115   :  { %143 = vsyncadd [#allocation4], 4294967168 }
 0x116   :  { %85 = vsyncpa [#allocation3], 1 }
 0x117   :  { %86 = vsyncpa [#allocation4], 1 }

</bundles_post_ra>
